<compile_context>
chip_gen: v6e
topology: v6e:2x2x1
jax: 0.10.0
libtpu: 0.0.40
codegen_flags: <defaults>
</compile_context>

<pallas_src>
import math
import functools

import jax
import jax.numpy as jnp
from jax.experimental import pallas as pl
from jax.experimental.pallas import tpu as pltpu


def _round_up(x: int, m: int) -> int:
    return ((x + m - 1) // m) * m


def _gbe_kernel(vecs_ref, freqs_ref, phase_ref, w_ref, out_ref, *, eps: float):
    # vecs_ref : (3, TM)      f32   feature-major row tile
    # freqs_ref: (2*nb, 1)    f32   [f, f]
    # phase_ref: (2*nb, 1)    f32   [0...0, pi/2...pi/2]
    # w_ref    : (dim, 6*nb)  mxu dtype, columns pre-permuted to kernel layout
    # out_ref  : (dim, TM)    f32   feature-major (wrapper transposes back)
    x = vecs_ref[0:1, :]                                  # (1, TM)
    y = vecs_ref[1:2, :]
    z = vecs_ref[2:3, :]

    s = x * x + y * y + z * z + eps                       # (1, TM)  d^2 + eps
    inv_d = jax.lax.rsqrt(s)                              # (1, TM)  EUP rsqrt
    d = s * inv_d                                         # (1, TM)  sqrt(d^2+eps)

    # Single transcendental: cos(t) = sin(t + pi/2); the /d of venc is folded in.
    enc = jnp.sin(freqs_ref[...] * d + phase_ref[...]) * inv_d       # (2*nb, TM)

    # Direction-scaled encodings, feature-major: sublane concat (cheap vreg placement).
    vec_enc = jnp.concatenate(
        [enc * (x * inv_d), enc * (y * inv_d), enc * (z * inv_d)], axis=0
    )                                                     # (6*nb, TM)

    r = jnp.dot(w_ref[...], vec_enc.astype(w_ref.dtype),
                preferred_element_type=jnp.float32)       # (dim, TM), lane-dense
    out_ref[...] = r.astype(out_ref.dtype)


def gaussian_bessel_encoding_3d(vecs, fourier_freqs, weight, eps=1.0,
                                tile_m=4096, mxu_dtype=jnp.bfloat16):
    """vecs: (..., 3); fourier_freqs: (nb,); weight: (dim, 6*nb) [PyTorch Linear, no bias]."""
    nb = int(fourier_freqs.shape[0])
    dim = int(weight.shape[0])
    lead_shape = vecs.shape[:-1]
    n = int(math.prod(lead_shape)) if lead_shape else 1
    vecs_flat = vecs.reshape(n, 3).astype(jnp.float32)

    # Rows live on the lane axis -> tile size must be a multiple of 128.
    align = 128
    tm = min(int(tile_m), _round_up(n, align))
    if n > align:
        # Guarantee >=2 grid steps when possible so v7x's 2 TensorCores both get work.
        tm = min(tm, _round_up((n + 1) // 2, align))
    tm = max(align, _round_up(tm, align))
    n_pad = _round_up(n, tm)

    if n_pad != n:
        pad = n_pad - n
        if eps > 0:
            pad_rows = jnp.zeros((pad, 3), jnp.float32)
        else:
            # Keep inv_d finite on padded rows when eps == 0 (pad with unit vectors).
            pad_rows = jnp.concatenate(
                [jnp.ones((pad, 1), jnp.float32), jnp.zeros((pad, 2), jnp.float32)],
                axis=1)
        vecs_flat = jnp.concatenate([vecs_flat, pad_rows], axis=0)
    vecs_t = vecs_flat.T                                   # (3, n_pad) feature-major

    # Permute PyTorch flatten ordering (feature = k*3 + j) to kernel ordering
    # (j*2nb + k).  Pure glue, done once outside the kernel.
    w_perm = (weight.astype(jnp.float32)
                    .reshape(dim, 2 * nb, 3)
                    .transpose(0, 2, 1)
                    .reshape(dim, 6 * nb)
                    .astype(mxu_dtype))

    f32 = fourier_freqs.astype(jnp.float32)
    freqs_col = jnp.concatenate([f32, f32]).reshape(2 * nb, 1)
    phase_col = jnp.concatenate(
        [jnp.zeros((nb,), jnp.float32), jnp.full((nb,), 0.5 * math.pi, jnp.float32)]
    ).reshape(2 * nb, 1)

    grid = (n_pad // tm,)

    cost = pl.CostEstimate(
        flops=2 * n_pad * 6 * nb * dim + 14 * n_pad * nb + 16 * n_pad,
        transcendentals=n_pad * (2 * nb + 1),
        bytes_accessed=(4 * n_pad * (3 + dim)
                        + w_perm.size * w_perm.dtype.itemsize
                        + 4 * 4 * nb),
    )

    kernel = functools.partial(_gbe_kernel, eps=float(eps))

    out_fm = pl.pallas_call(
        kernel,
        out_shape=jax.ShapeDtypeStruct((dim, n_pad), jnp.float32),
        grid_spec=pltpu.PrefetchScalarGridSpec(
            num_scalar_prefetch=0,
            grid=grid,
            in_specs=[
                pl.BlockSpec((3, tm), lambda i: (0, i)),        # row tile of vecs
                pl.BlockSpec((2 * nb, 1), lambda i: (0, 0)),    # resident freqs
                pl.BlockSpec((2 * nb, 1), lambda i: (0, 0)),    # resident phase
                pl.BlockSpec((dim, 6 * nb), lambda i: (0, 0)),  # resident weight
            ],
            out_specs=pl.BlockSpec((dim, tm), lambda i: (0, i)),
        ),
        compiler_params=pltpu.CompilerParams(
            dimension_semantics=("parallel",)
        ),
        cost_estimate=cost,
    )(vecs_t, freqs_col, phase_col, w_perm)

    out = out_fm[:, :n].T                                  # (n, dim); cheap wrapper transpose
    return out.reshape(*lead_shape, dim)


def _reference(vecs, fourier_freqs, weight, eps=1.0):
    """Pure-JAX transcription of the PyTorch forward (for verification)."""
    d = jnp.sqrt(jnp.sum(vecs ** 2, axis=-1, keepdims=True) + eps)
    dirs = vecs / d
    enc = jnp.concatenate([jnp.sin(fourier_freqs * d), jnp.cos(fourier_freqs * d)], axis=-1)
    venc = (enc[..., :, None] * dirs[..., None, :]).reshape(*vecs.shape[:-1], -1) / d
    return venc @ weight.T


if __name__ == "__main__":
    key = jax.random.PRNGKey(0)
    k_vec, k_freq, k_w, k_vec2 = jax.random.split(key, 4)

    n_basis = 16
    dim = 32
    eps = 1.0

    # Deterministic synthetic parameters (shapes from __init__).
    fourier_freqs = jax.random.normal(k_freq, (n_basis,), dtype=jnp.float32) * math.pi
    fan_in = n_basis * 6
    weight = jax.random.normal(k_w, (dim, fan_in), dtype=jnp.float32) / math.sqrt(fan_in)

    # --- Small test (tiny N, single tile) ---
    batch, seq = 2, 8
    vecs = jax.random.normal(k_vec, (batch, seq, 3), dtype=jnp.float32)
    ref = _reference(vecs, fourier_freqs, weight, eps=eps)

    # f32 MXU path: exact semantics check.
    out_f32 = gaussian_bessel_encoding_3d(vecs, fourier_freqs, weight, eps=eps,
                                          mxu_dtype=jnp.float32)
    out_f32 = jax.block_until_ready(out_f32)
    assert out_f32.shape == (batch, seq, dim)
    assert jnp.allclose(out_f32, ref, atol=2e-4, rtol=2e-4), "mismatch vs reference (small, f32)"

    # Default bf16-MXU path: relaxed tolerance (bf16 operands, f32 accumulation).
    out_bf = gaussian_bessel_encoding_3d(vecs, fourier_freqs, weight, eps=eps)
    out_bf = jax.block_until_ready(out_bf)
    assert jnp.allclose(out_bf, ref, atol=3e-2, rtol=3e-2), "mismatch vs reference (small, bf16)"

    # --- Ragged / multi-tile test (N not a multiple of the tile -> padding + 2-step grid) ---
    b2, s2 = 3, 1000
    vecs2 = jax.random.normal(k_vec2, (b2, s2, 3), dtype=jnp.float32)
    ref2 = _reference(vecs2, fourier_freqs, weight, eps=eps)

    out2_f32 = gaussian_bessel_encoding_3d(vecs2, fourier_freqs, weight, eps=eps,
                                           mxu_dtype=jnp.float32)
    out2_f32 = jax.block_until_ready(out2_f32)
    assert out2_f32.shape == (b2, s2, dim)
    assert jnp.allclose(out2_f32, ref2, atol=2e-4, rtol=2e-4), "mismatch vs reference (ragged, f32)"

    out2_bf = gaussian_bessel_encoding_3d(vecs2, fourier_freqs, weight, eps=eps)
    out2_bf = jax.block_until_ready(out2_bf)
    assert jnp.allclose(out2_bf, ref2, atol=3e-2, rtol=3e-2), "mismatch vs reference (ragged, bf16)"

    print("KERNEL_OK")
</pallas_src>

<mosaic_0001>
module attributes {stable_mosaic.version = 11 : i64} {
  func.func @_gbe_kernel(%arg0: i32, %arg1: memref<3x128xf32, #tpu.memory_space<vmem>>, %arg2: memref<32x1xf32, #tpu.memory_space<vmem>>, %arg3: memref<32x1xf32, #tpu.memory_space<vmem>>, %arg4: memref<32x96xf32, #tpu.memory_space<vmem>>, %arg5: memref<32x128xf32, #tpu.memory_space<vmem>>) attributes {dimension_semantics = [#tpu.dimension_semantics<parallel>], iteration_bounds = array<i64: 1>, scalar_prefetch = 0 : i64, scratch_operands = 0 : i64, tpu.core_type = #tpu.core_type<tc>, window_params = [{transform_indices = @transform_0, window_bounds = array<i64: 3, 128>}, {pipeline_mode = #tpu.pipeline_mode<synchronous>, transform_indices = @transform_1, window_bounds = array<i64: 32, 1>}, {pipeline_mode = #tpu.pipeline_mode<synchronous>, transform_indices = @transform_2, window_bounds = array<i64: 32, 1>}, {pipeline_mode = #tpu.pipeline_mode<synchronous>, transform_indices = @transform_3, window_bounds = array<i64: 32, 96>}, {transform_indices = @transform_4, window_bounds = array<i64: 32, 128>}]} {
    %c0 = arith.constant 0 : index
    %c0_0 = arith.constant 0 : index
    %0 = vector.load %arg1[%c0, %c0_0] : memref<3x128xf32, #tpu.memory_space<vmem>>, vector<1x128xf32>
    %c1 = arith.constant 1 : index
    %c0_1 = arith.constant 0 : index
    %1 = vector.load %arg1[%c1, %c0_1] : memref<3x128xf32, #tpu.memory_space<vmem>>, vector<1x128xf32>
    %c2 = arith.constant 2 : index
    %c0_2 = arith.constant 0 : index
    %2 = vector.load %arg1[%c2, %c0_2] : memref<3x128xf32, #tpu.memory_space<vmem>>, vector<1x128xf32>
    %3 = arith.mulf %0, %0 : vector<1x128xf32>
    %4 = arith.mulf %1, %1 : vector<1x128xf32>
    %5 = arith.addf %3, %4 : vector<1x128xf32>
    %6 = arith.mulf %2, %2 : vector<1x128xf32>
    %7 = arith.addf %5, %6 : vector<1x128xf32>
    %cst = arith.constant 1.000000e+00 : f32
    %8 = vector.broadcast %cst : f32 to vector<1x128xf32>
    %9 = arith.addf %7, %8 : vector<1x128xf32>
    %10 = math.rsqrt %9 : vector<1x128xf32>
    %11 = arith.mulf %9, %10 : vector<1x128xf32>
    %c0_3 = arith.constant 0 : index
    %c0_4 = arith.constant 0 : index
    %12 = vector.load %arg2[%c0_3, %c0_4] : memref<32x1xf32, #tpu.memory_space<vmem>>, vector<32x1xf32>
    %13 = vector.broadcast %12 : vector<32x1xf32> to vector<32x128xf32>
    %14 = vector.broadcast %11 : vector<1x128xf32> to vector<32x128xf32>
    %15 = arith.mulf %13, %14 : vector<32x128xf32>
    %c0_5 = arith.constant 0 : index
    %c0_6 = arith.constant 0 : index
    %16 = vector.load %arg3[%c0_5, %c0_6] : memref<32x1xf32, #tpu.memory_space<vmem>>, vector<32x1xf32>
    %17 = vector.broadcast %16 : vector<32x1xf32> to vector<32x128xf32>
    %18 = arith.addf %15, %17 : vector<32x128xf32>
    %19 = math.sin %18 : vector<32x128xf32>
    %20 = vector.broadcast %10 : vector<1x128xf32> to vector<32x128xf32>
    %21 = arith.mulf %19, %20 : vector<32x128xf32>
    %22 = arith.mulf %0, %10 : vector<1x128xf32>
    %23 = vector.broadcast %22 : vector<1x128xf32> to vector<32x128xf32>
    %24 = arith.mulf %21, %23 : vector<32x128xf32>
    %25 = arith.mulf %1, %10 : vector<1x128xf32>
    %26 = vector.broadcast %25 : vector<1x128xf32> to vector<32x128xf32>
    %27 = arith.mulf %21, %26 : vector<32x128xf32>
    %28 = arith.mulf %2, %10 : vector<1x128xf32>
    %29 = vector.broadcast %28 : vector<1x128xf32> to vector<32x128xf32>
    %30 = arith.mulf %21, %29 : vector<32x128xf32>
    %31 = tpu.concatenate %24, %27, %30 in 0 : vector<32x128xf32>, vector<32x128xf32>, vector<32x128xf32> -> vector<96x128xf32>
    %c0_7 = arith.constant 0 : index
    %c0_8 = arith.constant 0 : index
    %32 = vector.load %arg4[%c0_7, %c0_8] : memref<32x96xf32, #tpu.memory_space<vmem>>, vector<32x96xf32>
    %cst_9 = arith.constant dense<0.000000e+00> : vector<32x128xf32>
    %33 = tpu.matmul %32, %31, %cst_9 {dimension_numbers = #tpu.dot_dimension_numbers<[1], [0], [0], [1], [0, 0, 1, 1], [], []>} : vector<32x96xf32>, vector<96x128xf32>, vector<32x128xf32> -> vector<32x128xf32>
    %c0_10 = arith.constant 0 : index
    %c0_11 = arith.constant 0 : index
    %34 = vector.load %arg5[%c0_10, %c0_11] : memref<32x128xf32, #tpu.memory_space<vmem>>, vector<32x128xf32>
    tpu.vector_store %arg5[%c0_10, %c0_11], %33 {strides = array<i32>} : memref<32x128xf32, #tpu.memory_space<vmem>>, vector<32x128xf32>,
    return
  }
  func.func @transform_0(%arg0: i32) -> (i32, i32) {
    %c0_i32 = arith.constant 0 : i32
    %c0_i32_0 = arith.constant 0 : i32
    return %c0_i32, %arg0 : i32, i32
  }
  func.func @transform_1(%arg0: i32) -> (i32, i32) {
    %c0_i32 = arith.constant 0 : i32
    %c0_i32_0 = arith.constant 0 : i32
    %c0_i32_1 = arith.constant 0 : i32
    return %c0_i32, %c0_i32_0 : i32, i32
  }
  func.func @transform_2(%arg0: i32) -> (i32, i32) {
    %c0_i32 = arith.constant 0 : i32
    %c0_i32_0 = arith.constant 0 : i32
    %c0_i32_1 = arith.constant 0 : i32
    return %c0_i32, %c0_i32_0 : i32, i32
  }
  func.func @transform_3(%arg0: i32) -> (i32, i32) {
    %c0_i32 = arith.constant 0 : i32
    %c0_i32_0 = arith.constant 0 : i32
    %c0_i32_1 = arith.constant 0 : i32
    return %c0_i32, %c0_i32_0 : i32, i32
  }
  func.func @transform_4(%arg0: i32) -> (i32, i32) {
    %c0_i32 = arith.constant 0 : i32
    %c0_i32_0 = arith.constant 0 : i32
    return %c0_i32, %arg0 : i32, i32
  }
}

</mosaic_0001>

<bundles_post_ra>
// kernel: tpu_custom_call.1
= control target key start
LH: loop header
LB: loop body
LE: loop exit
PB: predicated region body
PF: predicated region fallthrough
CT: control target
= control target key end

     0   :  { %v820_v2 = vmov 0   ;;  %s1251_s0 = inlined_call_operand.vmem [shape: f32[3,128], index: 0, kind: input, shape index: {}]   ;;  %s1252_s1 = inlined_call_operand.vmem [shape: f32[32,1], index: 1, kind: input, shape index: {}]   ;;  %s1253_s2 = inlined_call_operand.vmem [shape: f32[32,1], index: 2, kind: input, shape index: {}]   ;;  %s1254_s3 = inlined_call_operand.vmem [shape: f32[32,96], index: 3, kind: input, shape index: {}]   ;;  %s1255_s4 = inlined_call_operand.hbm [shape: f32[32,128], index: 4, kind: output, shape index: {}]  }
   0x1   :  { %v64_v0 = vld [vmem:[%s1253_s2 + $0x18] sm:$0xff]  ;;  %779 = vset.pattern.permute.xlu1 %v820_v2  ;;  %778 = vset.pattern.permute.xlu0 %v820_v2  ;;  %v31_v3 = vld [vmem:[%s1252_s1 + $0x10] sm:$0xff]  ;;  %v30_v4 = vld [vmem:[%s1252_s1 + $0x8] sm:$0xff] }
   0x2   :  { %v32_v1 = vld [vmem:[%s1252_s1 + $0x18] sm:$0xff]  ;;  %82 = vperm.xlu1 %779, %v64_v0  }
   0x3   :  { %50 = vperm.xlu0 %778, %v32_v1  }
   0x4   :  { %9 = vsyncpa [#allocation3], 0  ;;  %v63_v5 = vld [vmem:[%s1253_s2 + $0x10] sm:$0xff]  ;;  %v29_v6 = vld [vmem:[%s1252_s1] sm:$0xff]  ;;  %v53_v18 = vlaneseq  ;;  %v821_v55 = vmov 683565275  }
   0x5   :  { %v62_v7 = vld [vmem:[%s1253_s2 + $0x8] sm:$0xff]  ;;  %v61_v8 = vld [vmem:[%s1253_s2] sm:$0xff]  ;;  %v822_v57 = vmov 2475754826   ;;  %v823_v59 = vmov 2131351028  }
   0x6   :  { %40 = vperm.xlu1 %779, %v30_v4   ;;  %v882_v9 = vld [vmem:[%s1251_s0] sm:$0x1]  ;;  %v887_v10 = vld [vmem:[%s1251_s0 + $0x1] sm:$0x1]  ;;  %v896_v13 = vld [vmem:[%s1251_s0 + $0x2] sm:$0x1] }
   0x7   :  { %45 = vperm.xlu0 %778, %v31_v3   ;;  %v21_v11 = vmul.f32 %v882_v9, %v882_v9  ;;  %v22_v12 = vmul.f32 %v887_v10, %v887_v10  ;;  %v24_v15 = vmul.f32 %v896_v13, %v896_v13  ;;  %v54_v19 = vshrl.u32 %v53_v18, 7  ;;  %s827_s16 = smov [#allocation2]  }
   0x8   :  { %v824_v61 = vmov 2102212464   ;;  %v825_v2 = vmov 920167782   ;;  %s651_s17 = sshll.u32 %s827_s16, 4  ;;  %s652_s17 = int_to_ptr.vmem [resolvable:$true] %s651_s17 }
   0x9   :  { %v23_v14 = vadd.f32 %v22_v12, %v21_v11  ;;  %v902_v21 = vsub.s32 0, %v54_v19  ;;  %p803_p1 = scmp.lt.s32.totalorder %s652_s17, %s652_s17 }
   0xa   :  { %35 = vperm.xlu1 %779, %v29_v6   ;;  %v826_v6 = vmov 1326507024  }
   0xb   :  { %77 = vperm.xlu0 %778, %v63_v5   ;;  %v25_v16 = vadd.f32 %v24_v15, %v23_v14 }
   0xd   :  { %v26_v17 = vadd.f32 1.0, %v25_v16 }
   0xe   :  { %67 = vperm.xlu1 %779, %v61_v8  }
   0xf   :  { %72 = vperm.xlu0 %778, %v62_v7   ;;  %780 = vrsqrt.f32 %v26_v17 }
  0x1c   :  { %v900_v20 = vpop.eup %780 }
  0x1d   :  { %v28_v22 = vmul.f32 %v900_v20, %v26_v17 }
  0x1f   :  { %v906_v23 = vrot.slane %v28_v22, %v902_v21 }
  0x7d   :  { %v83_v26 = vpop.permute.xlu1 %82 }
  0x7e   :  { %v51_v24 = vpop.permute.xlu0 %50 }
  0x7f   :  { %v60_v25 = vmul.f32 %v906_v23, %v51_v24 }
  0x81   :  { %v909_v27 = vadd.f32 %v83_v26, %v60_v25  ;;  %v41_v34 = vpop.permute.xlu1 %40 }
  0x82   :  { %v46_v28 = vpop.permute.xlu0 %45  ;;  %v58_v39 = vmul.f32 %v906_v23, %v41_v34 }
  0x83   :  { %v401_v29 = vand.u32 2147483647, %v909_v27  ;;  %v404_v30 = vand.u32 2139095040, %v909_v27  ;;  %v59_v32 = vmul.f32 %v906_v23, %v46_v28  ;;  %vm403_vm13 = vcmp.lt.s32.totalorder %v909_v27, 0 }
  0x85   :  { %v405_v31 = vshrl.u32 %v404_v30, 23  ;;  %v408_v33 = vand.u32 8388607, %v401_v29 }
  0x86   :  { %v78_v35 = vpop.permute.xlu0 %77 }
  0x87   :  { %v674_v36 = vadd.s32 4294967169, %v405_v31  ;;  %v916_v37 = vadd.f32 %v78_v35, %v59_v32  ;;  %v409_v41 = vor.u32 8388608, %v408_v33 }
  0x89   :  { %v411_v38 = vadd.s32 1, %v674_v36  ;;  %v297_v40 = vand.u32 2147483647, %v916_v37  ;;  %v300_v42 = vand.u32 2139095040, %v916_v37  ;;  %v925_v50 = vshll.u32 %v409_v41, 8 }
  0x8a   :  { %v73_v43 = vpop.permute.xlu0 %72 }
  0x8b   :  { %vm412_vm0 = vcmp.gt.s32.totalorder %v411_v38, 0  ;;  %v304_v44 = vand.u32 8388607, %v297_v40  ;;  %v923_v45 = vadd.f32 %v73_v43, %v58_v39  ;;  %v301_v47 = vshrl.u32 %v300_v42, 23 }
  0x8c   :  { %v413_v46 = vsel %vm412_vm0, %v411_v38, 0 }
  0x8d   :  { %v415_v48 = vand.u32 31, %v413_v46  ;;  %v414_v49 = vshrl.u32 %v413_v46, 5  ;;  %v670_v52 = vadd.s32 4294967169, %v301_v47  ;;  %v305_v53 = vor.u32 8388608, %v304_v44 }
  0x8e   :  { %v196_v54 = vand.u32 2139095040, %v923_v45 }
  0x8f   :  { %v416_v51 = vsub.s32 32, %v415_v48  ;;  %v418_v56 = vshll.u32 %v821_v55, %v415_v48  ;;  %v421_v58 = vshll.u32 %v822_v57, %v415_v48  ;;  %v424_v60 = vshll.u32 %v823_v59, %v415_v48 }
  0x90   :  { %v427_v62 = vshll.u32 %v824_v61, %v415_v48  ;;  %v430_v3 = vshll.u32 %v825_v2, %v415_v48  ;;  %vm433_vm1 = vcmp.lt.s32.totalorder %v414_v49, 1  ;;  %v307_v14 = vadd.s32 1, %v670_v52 }
  0x91   :  { %v419_v63 = vshrl.u32 %v822_v57, %v416_v51  ;;  %v422_v0 = vshrl.u32 %v823_v59, %v416_v51  ;;  %v425_v1 = vshrl.u32 %v824_v61, %v416_v51  ;;  %v417_v4 = vshrl.u32 %v821_v55, %v416_v51 }
  0x92   :  { %v428_v5 = vshrl.u32 %v825_v2, %v416_v51  ;;  %v431_v7 = vshrl.u32 %v826_v6, %v416_v51  ;;  %vm435_vm2 = vcmp.lt.s32.totalorder %v414_v49, 3  ;;  %vm436_vm3 = vcmp.lt.s32.totalorder %v414_v49, 4 }
  0x93   :  { %v420_v8 = vor.u32 %v419_v63, %v418_v56  ;;  %v423_v11 = vor.u32 %v422_v0, %v421_v58  ;;  %v426_v12 = vor.u32 %v425_v1, %v424_v60  ;;  %vm308_vm4 = vcmp.gt.s32.totalorder %v307_v14, 0 }
  0x94   :  { %v429_v15 = vor.u32 %v428_v5, %v427_v62  ;;  %v432_v16 = vor.u32 %v431_v7, %v430_v3  ;;  %vm434_vm5 = vcmp.lt.s32.totalorder %v414_v49, 2  ;;  %v309_v31 = vsel %vm308_vm4, %v307_v14, 0 }
  0x95   :  { %v437_v17 = vsel %vm433_vm1, %v417_v4, %v420_v8  ;;  %v438_v18 = vsel %vm436_vm3, %v426_v12, 2102212464  ;;  %v441_v19 = vsel %vm433_vm1, %v420_v8, %v423_v11  ;;  %v445_v22 = vsel %vm433_vm1, %v423_v11, %v426_v12  ;;  %v36_v8 = vpop.permute.xlu1 %35 }
  0x96   :  { %v439_v24 = vsel %vm435_vm2, %v423_v11, %v438_v18  ;;  %v442_v25 = vsel %vm436_vm3, %v429_v15, 920167782  ;;  %v446_v26 = vsel %vm436_vm3, %v432_v16, 1326507024  ;;  %v310_v35 = vshrl.u32 %v309_v31, 5 }
  0x97   :  { %v443_v28 = vsel %vm435_vm2, %v426_v12, %v442_v25  ;;  %v447_v30 = vsel %vm435_vm2, %v429_v15, %v446_v26  ;;  %v440_v32 = vsel %vm434_vm5, %v437_v17, %v439_v24  ;;  %v311_v42 = vand.u32 31, %v309_v31 }
  0x98   :  { %v444_v33 = vsel %vm434_vm5, %v441_v19, %v443_v28  ;;  %v448_v34 = vsel %vm434_vm5, %v445_v22, %v447_v30  ;;  %v456_v43 = vmul.u32 %v925_v50, %v440_v32  ;;  %vm329_vm6 = vcmp.lt.s32.totalorder %v310_v35, 1 }
  0x99   :  { %v940_v36 = vmul.u32.u64.low %v925_v50, %v448_v34  ;;  %v941_v38 = vmul.u32.u64.high %v925_v50, %v448_v34, %v940_v36  ;;  %v944_v39 = vmul.u32.u64.low %v925_v50, %v444_v33  ;;  %v945_v41 = vmul.u32.u64.high %v925_v50, %v444_v33, %v944_v39 }
  0x9a   :  { %v949_v44 = vshll.u32 %v305_v53, 8  ;;  %v312_v46 = vsub.s32 32, %v311_v42  ;;  %v314_v47 = vshll.u32 %v821_v55, %v311_v42  ;;  %vm330_vm7 = vcmp.lt.s32.totalorder %v310_v35, 2 }
  0x9b   :  { %v197_v48 = vshrl.u32 %v196_v54, 23  ;;  %vm458_vm8 = vc.u32 %v941_v38, %v944_v39  ;;  %v459_v49 = vadd.s32 1, %v945_v41  ;;  %v317_v51 = vshll.u32 %v822_v57, %v311_v42 }
  0x9c   :  { %v320_v52 = vshll.u32 %v823_v59, %v311_v42  ;;  %v315_v56 = vshrl.u32 %v822_v57, %v312_v46  ;;  %v318_v50 = vshrl.u32 %v823_v59, %v312_v46  ;;  %v321_v53 = vshrl.u32 %v824_v61, %v312_v46 }
  0x9d   :  { %v323_v58 = vshll.u32 %v824_v61, %v311_v42  ;;  %v460_v60 = vsel %vm458_vm8, %v459_v49, %v945_v41  ;;  %v324_v54 = vshrl.u32 %v825_v2, %v312_v46  ;;  %v326_v62 = vshll.u32 %v825_v2, %v311_v42 }
  0x9e   :  { %v327_v63 = vshrl.u32 %v826_v6, %v312_v46  ;;  %v461_v0 = vadd.s32 %v460_v60, %v456_v43  ;;  %v316_v1 = vor.u32 %v315_v56, %v314_v47  ;;  %v319_v3 = vor.u32 %v318_v50, %v317_v51 }
  0x9f   :  { %v322_v4 = vor.u32 %v321_v53, %v320_v52  ;;  %v325_v5 = vor.u32 %v324_v54, %v323_v58  ;;  %vm332_vm9 = vcmp.lt.s32.totalorder %v310_v35, 4  ;;  %v666_v11 = vadd.s32 4294967169, %v197_v48 }
  0xa0   :  { %v328_v7 = vor.u32 %v327_v63, %v326_v62  ;;  %v462_v12 = vadd.s32 536870912, %v461_v0  ;;  %v313_v14 = vshrl.u32 %v821_v55, %v312_v46  ;;  %v337_v16 = vsel %vm329_vm6, %v316_v1, %v319_v3  ;;  %v68_v46 = vpop.permute.xlu1 %67 }
  0xa1   :  { %v334_v15 = vsel %vm332_vm9, %v322_v4, 2102212464  ;;  %vm331_vm10 = vcmp.lt.s32.totalorder %v310_v35, 3  ;;  %v338_v17 = vsel %vm332_vm9, %v325_v5, 920167782  ;;  %v341_v18 = vsel %vm329_vm6, %v319_v3, %v322_v4 }
  0xa2   :  { %v342_v19 = vsel %vm332_vm9, %v328_v7, 1326507024  ;;  %v968_v22 = vshrl.u32 %v462_v12, 30  ;;  %v333_v24 = vsel %vm329_vm6, %v313_v14, %v316_v1  ;;  %v339_v25 = vsel %vm331_vm10, %v322_v4, %v338_v17 }
  0xa3   :  { %v343_v26 = vsel %vm331_vm10, %v325_v5, %v342_v19  ;;  %v335_v28 = vsel %vm331_vm10, %v319_v3, %v334_v15  ;;  %v340_v30 = vsel %vm330_vm7, %v337_v16, %v339_v25  ;;  %v203_v32 = vadd.s32 1, %v666_v11 }
  0xa4   :  { %v344_v31 = vsel %vm330_vm7, %v341_v18, %v343_v26  ;;  %v464_v33 = vshll.u32 %v968_v22, 30  ;;  %v979_v41 = vmul.u32.u64.low %v949_v44, %v340_v30  ;;  %v980_v42 = vmul.u32.u64.high %v949_v44, %v340_v30, %v979_v41 }
  0xa5   :  { %v975_v34 = vmul.u32.u64.low %v949_v44, %v344_v31  ;;  %v976_v36 = vmul.u32.u64.high %v949_v44, %v344_v31, %v975_v34  ;;  %v193_v43 = vand.u32 2147483647, %v923_v45  ;;  %vm204_vm11 = vcmp.gt.s32.totalorder %v203_v32, 0 }
  0xa6   :  { %v984_v47 = vsub.s32 %v461_v0, %v464_v33  ;;  %v336_v48 = vsel %vm330_vm7, %v333_v24, %v335_v28  ;;  %v57_v49 = vmul.f32 %v906_v23, %v36_v8  ;;  %v205_v51 = vsel %vm204_vm11, %v203_v32, 0 }
  0xa7   :  { %v207_v52 = vand.u32 31, %v205_v51  ;;  %v991_v50 = vmul.f32 %v900_v20, %v896_v13  ;;  %vm354_vm12 = vc.u32 %v976_v36, %v979_v41  ;;  %v352_v58 = vmul.u32 %v949_v44, %v336_v48 }
  0xa8   :  { %v467_v56 = vsub.s32 0, %v984_v47  ;;  %v995_v53 = vadd.f32 %v68_v46, %v57_v49  ;;  %v355_v35 = vadd.s32 1, %v980_v42  ;;  %v200_v23 = vand.u32 8388607, %v193_v43 }
  0xa9   :  { %v208_v60 = vsub.s32 32, %v207_v52  ;;  %v1002_v62 = vshrl.u32 %v205_v51, 5  ;;  %v210_v13 = vshll.u32 %v821_v55, %v207_v52  ;;  %v213_v63 = vshll.u32 %v822_v57, %v207_v52 }
  0xaa   :  { %v675_v54 = vmin.u32 %v467_v56, %v984_v47  ;;  %v356_v0 = vsel %vm354_vm12, %v355_v35, %v980_v42  ;;  %v219_v3 = vshll.u32 %v824_v61, %v207_v52  ;;  %v216_v14 = vshll.u32 %v823_v59, %v207_v52 }
  0xab   :  { %v211_v1 = vshrl.u32 %v822_v57, %v208_v60  ;;  %v214_v44 = vshrl.u32 %v823_v59, %v208_v60  ;;  %v357_v5 = vadd.s32 %v356_v0, %v352_v58  ;;  %v217_v7 = vshrl.u32 %v824_v61, %v208_v60 }
  0xac   :  { %v469_v4 = vclz %v675_v54  ;;  %v220_v8 = vshrl.u32 %v825_v2, %v208_v60  ;;  %v223_v15 = vshrl.u32 %v826_v6, %v208_v60  ;;  %v222_v19 = vshll.u32 %v825_v2, %v207_v52 }
  0xad   :  { %v212_v11 = vor.u32 %v211_v1, %v210_v13  ;;  %v215_v12 = vor.u32 %v214_v44, %v213_v63  ;;  %v358_v17 = vadd.s32 536870912, %v357_v5  ;;  %v457_v24 = vadd.s32 %v944_v39, %v941_v38 }
  0xae   :  { %v676_v16 = vadd.s32 4294967294, %v469_v4  ;;  %v221_v18 = vor.u32 %v220_v8, %v219_v3  ;;  %v487_v25 = vsub.s32 4, %v968_v22  ;;  %v201_v26 = vor.u32 8388608, %v200_v23 }
  0xaf   :  { %v218_v28 = vor.u32 %v217_v7, %v216_v14  ;;  %v1019_v30 = vshrl.u32 %v358_v17, 30  ;;  %v224_v31 = vor.u32 %v223_v15, %v222_v19  ;;  %vm228_vm15 = vcmp.lt.s32.totalorder %v1002_v62, 4 }
  0xb0   :  { %vm677_vm14 = vcmp.lt.s32.totalorder %v676_v16, 0  ;;  %vm225_vm0 = vcmp.lt.s32.totalorder %v1002_v62, 1  ;;  %vm227_vm1 = vcmp.lt.s32.totalorder %v1002_v62, 3  ;;  %v234_v33 = vsel %vm228_vm15, %v221_v18, 920167782 }
  0xb1   :  { %v472_v32 = vsel %vm677_vm14, 0, %v676_v16  ;;  %v360_v39 = vshll.u32 %v1019_v30, 30  ;;  %v233_v42 = vsel %vm225_vm0, %v212_v11, %v215_v12  ;;  %v209_v46 = vshrl.u32 %v821_v55, %v208_v60 }
  0xb2   :  { %v473_v34 = vsub.s32 32, %v472_v32  ;;  %v477_v38 = vsub.s32 4294967266, %v472_v32  ;;  %vm226_vm2 = vcmp.lt.s32.totalorder %v1002_v62, 2  ;;  %v230_v48 = vsel %vm228_vm15, %v218_v28, 2102212464 }
  0xb3   :  { %v235_v49 = vsel %vm227_vm1, %v218_v28, %v234_v33  ;;  %v474_v51 = vshll.u32 %v984_v47, %v472_v32  ;;  %v1036_v58 = vsub.s32 %v357_v5, %v360_v39  ;;  %v237_v23 = vsel %vm225_vm0, %v215_v12, %v218_v28 }
  0xb4   :  { %v475_v52 = vshrl.u32 %v457_v24, %v473_v34  ;;  %v478_v56 = vadd.s32 127, %v477_v38  ;;  %v236_v35 = vsel %vm226_vm2, %v233_v42, %v235_v49  ;;  %v238_v60 = vsel %vm228_vm15, %v224_v31, 1326507024 }
  0xb5   :  { %v241_v54 = vshll.u32 %v201_v26, 8  ;;  %v363_v0 = vsub.s32 0, %v1036_v58  ;;  %v229_v47 = vsel %vm225_vm0, %v209_v46, %v212_v11  ;;  %v231_v1 = vsel %vm227_vm1, %v215_v12, %v230_v48 }
  0xb6   :  { %v476_v13 = vor.u32 %v475_v52, %v474_v51  ;;  %v479_v63 = vshll.u32 %v478_v56, 23  ;;  %v239_v44 = vsel %vm227_vm1, %v221_v18, %v238_v60  ;;  %v488_v7 = vsel %vm403_vm13, %v487_v25, %v968_v22 }
  0xb7   :  { %v1051_v3 = vmul.u32.u64.low %v241_v54, %v236_v35  ;;  %v1052_v4 = vmul.u32.u64.high %v241_v54, %v236_v35, %v1051_v3  ;;  %v671_v8 = vmin.u32 %v363_v0, %v1036_v58  ;;  %v240_v11 = vsel %vm226_vm2, %v237_v23, %v239_v44  ;;  %v540_v0 = vld [vmem:[%s1254_s3] sm:$0xff] }
  0xb8   :  { %v480_v5 = vor.u32 4788187, %v479_v63  ;;  %vm1063_vm3 = vcmp.le.f32.partialorder %v401_v29, 0.7853982  ;;  %v1067_v14 = vmul.u32.u64.low %v241_v54, %v240_v11  ;;  %v1068_v15 = vmul.u32.u64.high %v241_v54, %v240_v11, %v1067_v14 }
  0xb9   :  { %v92_v16 = vand.u32 2139095040, %v995_v53  ;;  %v483_v18 = vcvt.s32.f32 %v476_v13  ;;  %v365_v19 = vclz %v671_v8  ;;  %v232_v22 = vsel %vm226_vm2, %v229_v47, %v231_v1  ;;  %v542_v47 = vld [vmem:[%s1254_s3 + $0x10] sm:$0xff] }
  0xba   :  { %v481_v17 = vand.u32 2147483647, %v480_v5  ;;  %v490_v24 = vsel %vm1063_vm3, 0, %v488_v7  ;;  %v251_v25 = vadd.s32 1, %v1052_v4  ;;  %v1078_v26 = vrot.slane %v900_v20, %v902_v21 }
  0xbb   :  { %v93_v29 = vshrl.u32 %v92_v16, 23  ;;  %vm299_vm4 = vcmp.lt.s32.totalorder %v916_v37, 0  ;;  %v672_v31 = vadd.s32 4294967294, %v365_v19  ;;  %v1083_v32 = vrot.slane %v991_v50, %v902_v21 }
  0xbc   :  { %v484_v28 = vmul.f32 %v483_v18, %v481_v17  ;;  %v248_v62 = vmul.u32 %v241_v54, %v232_v22  ;;  %vm250_vm5 = vc.u32 %v1068_v15, %v1051_v3  ;;  %v89_v33 = vand.u32 2147483647, %v995_v53 }
  0xbd   :  { %v662_v34 = vadd.s32 4294967169, %v93_v29  ;;  %v494_v39 = vadd.s32 3, %v490_v24  ;;  %vm673_vm6 = vcmp.lt.s32.totalorder %v672_v31, 0  ;;  %v252_v42 = vsel %vm250_vm5, %v251_v25, %v1052_v4 }
  0xbe   :  { %v485_v38 = vxor.u32 2147483648, %v484_v28  ;;  %v353_v46 = vadd.s32 %v979_v41, %v976_v36  ;;  %v368_v48 = vsel %vm673_vm6, 0, %v672_v31  ;;  %v253_v49 = vadd.s32 %v252_v42, %v248_v62 }
  0xbf   :  { %v99_v51 = vadd.s32 1, %v662_v34  ;;  %v369_v52 = vsub.s32 32, %v368_v48  ;;  %v373_v56 = vsub.s32 4294967266, %v368_v48  ;;  %v383_v35 = vsub.s32 4, %v1019_v30 }
  0xc0   :  { %v486_v50 = vsel %vm403_vm13, %v485_v38, %v484_v28  ;;  %v254_v60 = vadd.s32 536870912, %v253_v49  ;;  %v96_v54 = vand.u32 8388607, %v89_v33  ;;  %v370_v36 = vshll.u32 %v1036_v58, %v368_v48 }
  0xc1   :  { %v489_v23 = vsel %vm1063_vm3, %v909_v27, %v486_v50  ;;  %vm100_vm7 = vcmp.gt.s32.totalorder %v99_v51, 0  ;;  %v371_v41 = vshrl.u32 %v353_v46, %v369_v52  ;;  %v374_v13 = vadd.s32 127, %v373_v56 }
  0xc2   :  { %v101_v63 = vsel %vm100_vm7, %v99_v51, 0  ;;  %v1106_v1 = vand.u32 3, %v494_v39  ;;  %vm1110_vm8 = vcmp.le.f32.partialorder %v297_v40, 0.7853982  ;;  %v1114_v58 = vshrl.u32 %v254_v60, 30 }
  0xc3   :  { %v103_v4 = vand.u32 31, %v101_v63  ;;  %782 = vsinq.f32 %v489_v23  ;;  %v372_v5 = vor.u32 %v371_v41, %v370_v36  ;;  %v375_v7 = vshll.u32 %v374_v13, 23 }
  0xc4   :  { %vm544_vm9 = vcmask 785408   ;;  %784 = vcosq.f32 %v489_v23  ;;  %v1119_v8 = vsel %vm299_vm4, %v383_v35, %v1019_v30  ;;  %v256_v11 = vshll.u32 %v1114_v58, 30 }
  0xc5   :  { %v104_v12 = vsub.s32 32, %v103_v4  ;;  %722 = vmatprep.mubr.msk.f32.mxu0 %vm544_vm9, %v540_v0  ;;  %725 = vmatprep.mubr.msk.f32.mxu1 %vm544_vm9, %v542_v47  ;;  %v376_v40 = vor.u32 4788187, %v375_v7  ;;  %v97_v14 = vor.u32 8388608, %v96_v54  ;;  %v102_v16 = vshrl.u32 %v101_v63, 5 }
  0xc6   :  { %v106_v17 = vshll.u32 %v821_v55, %v103_v4  ;;  %v379_v18 = vcvt.s32.f32 %v372_v5  ;;  %v1125_v19 = vsub.s32 %v253_v49, %v256_v11  ;;  %v109_v30 = vshll.u32 %v822_v57, %v103_v4 }
  0xc7   :  { %v107_v22 = vshrl.u32 %v822_v57, %v104_v12  ;;  %v377_v24 = vand.u32 2147483647, %v376_v40  ;;  %v110_v25 = vshrl.u32 %v823_v59, %v104_v12  ;;  %v112_v29 = vshll.u32 %v823_v59, %v103_v4 }
  0xc8   :  { %v113_v28 = vshrl.u32 %v824_v61, %v104_v12  ;;  %v386_v31 = vsel %vm1110_vm8, 0, %v1119_v8  ;;  %v259_v62 = vsub.s32 0, %v1125_v19  ;;  %v115_v38 = vshll.u32 %v824_v61, %v103_v4 }
  0xc9   :  { %v108_v34 = vor.u32 %v107_v22, %v106_v17  ;;  %v380_v39 = vmul.f32 %v379_v18, %v377_v24  ;;  %v111_v42 = vor.u32 %v110_v25, %v109_v30  ;;  %v116_v57 = vshrl.u32 %v825_v2, %v104_v12 }
  0xca   :  { %v114_v46 = vor.u32 %v113_v28, %v112_v29  ;;  %v667_v48 = vmin.u32 %v259_v62, %v1125_v19  ;;  %v118_v59 = vshll.u32 %v825_v2, %v103_v4  ;;  %v119_v49 = vshrl.u32 %v826_v6, %v104_v12 }
  0xcb   :  { %v137_v51 = vshll.u32 %v97_v14, 8  ;;  %v381_v50 = vxor.u32 2147483648, %v380_v39  ;;  %v105_v52 = vshrl.u32 %v821_v55, %v104_v12  ;;  %v117_v56 = vor.u32 %v116_v57, %v115_v38 }
  0xcc   :  { %vm121_vm10 = vcmp.lt.s32.totalorder %v102_v16, 1  ;;  %v261_v35 = vclz %v667_v48  ;;  %v120_v23 = vor.u32 %v119_v49, %v118_v59  ;;  %vm122_vm11 = vcmp.lt.s32.totalorder %v102_v16, 2 }
  0xcd   :  { %vm124_vm12 = vcmp.lt.s32.totalorder %v102_v16, 4  ;;  %vm497_vm13 = vcmp.eq.s32.totalorder %v1106_v1, 0  ;;  %v382_v61 = vsel %vm299_vm4, %v381_v50, %v380_v39  ;;  %vm123_vm14 = vcmp.lt.s32.totalorder %v102_v16, 3 }
  0xce   :  { %v126_v2 = vsel %vm124_vm12, %v114_v46, 2102212464  ;;  %v129_v6 = vsel %vm121_vm10, %v108_v34, %v111_v42  ;;  %v385_v55 = vsel %vm1110_vm8, %v916_v37, %v382_v61  ;;  %v668_v60 = vadd.s32 4294967294, %v261_v35 }
  0xcf   :  { %v125_v54 = vsel %vm121_vm10, %v105_v52, %v108_v34  ;;  %v130_v36 = vsel %vm124_vm12, %v117_v56, 920167782  ;;  %786 = vcosq.f32 %v385_v55  ;;  %v127_v41 = vsel %vm123_vm14, %v111_v42, %v126_v2 }
  0xd0   :  { %v131_v13 = vsel %vm123_vm14, %v114_v46, %v130_v36  ;;  %v133_v63 = vsel %vm121_vm10, %v111_v42, %v114_v46  ;;  %v783_v0 = vpop.eup %782  ;;  %788 = vsinq.f32 %v385_v55  ;;  %vm669_vm15 = vcmp.lt.s32.totalorder %v668_v60, 0 }
  0xd1   :  { %v132_v47 = vsel %vm122_vm11, %v129_v6, %v131_v13  ;;  %v134_v44 = vsel %vm124_vm12, %v120_v23, 1326507024  ;;  %v785_v4 = vpop.eup %784  ;;  %v264_v5 = vsel %vm669_vm15, 0, %v668_v60  ;;  %v249_v12 = vadd.s32 %v1051_v3, %v1068_v15 }
  0xd2   :  { %v135_v7 = vsel %vm123_vm14, %v117_v56, %v134_v44  ;;  %v1158_v8 = vmul.u32.u64.low %v137_v51, %v132_v47  ;;  %v1159_v11 = vmul.u32.u64.high %v137_v51, %v132_v47, %v1158_v8  ;;  %v265_v40 = vsub.s32 32, %v264_v5 }
  0xd3   :  { %v269_v14 = vsub.s32 4294967266, %v264_v5  ;;  %v136_v17 = vsel %vm122_vm11, %v133_v63, %v135_v7  ;;  %v128_v18 = vsel %vm122_vm11, %v125_v54, %v127_v41  ;;  %v498_v24 = vxor.u32 2147483648, %v783_v0 }
  0xd4   :  { %v1166_v22 = vmul.u32.u64.low %v137_v51, %v136_v17  ;;  %v1167_v30 = vmul.u32.u64.high %v137_v51, %v136_v17, %v1166_v22  ;;  %v266_v25 = vshll.u32 %v1125_v19, %v264_v5  ;;  %v267_v29 = vshrl.u32 %v249_v12, %v265_v40 }
  0xd5   :  { %v270_v28 = vadd.s32 127, %v269_v14  ;;  %v501_v62 = vxor.u32 2147483648, %v785_v4  ;;  %v390_v34 = vadd.s32 3, %v386_v31  ;;  %v147_v38 = vadd.s32 1, %v1159_v11 }
  0xd6   :  { %v499_v3 = vsel %vm497_vm13, %v785_v4, %v498_v24  ;;  %vm500_vm0 = vcmp.eq.s32.totalorder %v1106_v1, 2  ;;  %v268_v15 = vor.u32 %v267_v29, %v266_v25  ;;  %vm496_vm1 = vcmp.lt.s32.totalorder %v1106_v1, 2 }
  0xd7   :  { %v271_v16 = vshll.u32 %v270_v28, 23  ;;  %v502_v39 = vsel %vm500_vm0, %v501_v62, %v783_v0  ;;  %v144_v42 = vmul.u32 %v137_v51, %v128_v18  ;;  %vm146_vm2 = vc.u32 %v1167_v30, %v1158_v8 }
  0xd8   :  { %vm493_vm3 = vweird.f32 %v909_v27  ;;  %v503_v19 = vsel %vm496_vm1, %v499_v3, %v502_v39  ;;  %v148_v46 = vsel %vm146_vm2, %v147_v38, %v1159_v11  ;;  %v391_v49 = vand.u32 3, %v390_v34 }
  0xd9   :  { %v272_v31 = vor.u32 4788187, %v271_v16  ;;  %v504_v57 = vsel %vm493_vm3, nan, %v503_v19  ;;  %v149_v48 = vadd.s32 %v148_v46, %v144_v42  ;;  %v275_v52 = vcvt.s32.f32 %v268_v15 }
  0xda   :  { %v1180_v59 = vmul.f32 %v1078_v26, %v504_v57  ;;  %vm195_vm4 = vcmp.lt.s32.totalorder %v923_v45, 0  ;;  %vm396_vm5 = vcmp.eq.s32.totalorder %v391_v49, 2  ;;  %v279_v55 = vsub.s32 4, %v1114_v58 }
  0xdb   :  { %v273_v50 = vand.u32 2147483647, %v272_v31  ;;  %v150_v1 = vadd.s32 536870912, %v149_v48  ;;  %vm393_vm6 = vcmp.eq.s32.totalorder %v391_v49, 0  ;;  %vm1191_vm7 = vcmp.le.f32.partialorder %v193_v43, 0.7853982 }
  0xdc   :  { %v539_v51 = vmul.f32 %v1083_v32, %v1180_v59  ;;  %v787_v56 = vpop.eup %786  ;;  %vm392_vm8 = vcmp.lt.s32.totalorder %v391_v49, 2  ;;  %vm389_vm10 = vweird.f32 %v916_v37  ;;  %v280_v43 = vsel %vm195_vm4, %v279_v55, %v1114_v58 }
  0xdd   :  { %v276_v35 = vmul.f32 %v275_v52, %v273_v50  ;;  %v789_v23 = vpop.eup %788  ;;  %v1184_v27 = vshrl.u32 %v150_v1, 30  ;;  %v397_v61 = vxor.u32 2147483648, %v787_v56  ;;  %v282_v11 = vsel %vm1191_vm7, 0, %v280_v43  ;;  %v543_v43 = vld [vmem:[%s1254_s3 + $0x18] sm:$0xff] }
  0xde   :  { %698 = vmatprep.subr.mxu0 %v539_v51  ;;  %728 = vmatprep.subr.mxu1 %v539_v51  ;;  %v394_v6 = vxor.u32 2147483648, %v789_v23  ;;  %v286_v40 = vadd.s32 3, %v282_v11  ;;  %v145_v18 = vadd.s32 %v1158_v8, %v1167_v30  ;;  %vm285_vm15 = vweird.f32 %v923_v45 }
  0xdf   :  { %v277_v2 = vxor.u32 2147483648, %v276_v35  ;;  %699 = vmatpush3.msra.mxu0 %v539_v51  ;;  %740 = vmatpush3.msra.mxu1 %v539_v51  ;;  %v152_v60 = vshll.u32 %v1184_v27, 30  ;;  %v398_v54 = vsel %vm396_vm5, %v397_v61, %v789_v23  ;;  %vm91_vm0 = vcmp.lt.s32.totalorder %v995_v53, 0 }
  0xe0   :  { %v395_v13 = vsel %vm393_vm6, %v787_v56, %v394_v6  ;;  %v287_v17 = vand.u32 3, %v286_v40  ;;  %v175_v52 = vsub.s32 4, %v1184_v27  ;;  %vm90_vm1 = vcmp.le.f32.partialorder %v89_v33, 0.7853982 }
  0xe1   :  { %v278_v41 = vsel %vm195_vm4, %v277_v2, %v276_v35  ;;  %v153_v0 = vsub.s32 %v149_v48, %v152_v60  ;;  %v399_v47 = vsel %vm392_vm8, %v395_v13, %v398_v54  ;;  %v522_v33 = vmul.f32 %v900_v20, %v887_v10 }
  0xe2   :  { %v281_v63 = vsel %vm1191_vm7, %v923_v45, %v278_v41  ;;  %v400_v44 = vsel %vm389_vm10, nan, %v399_v47  ;;  %vm292_vm12 = vcmp.eq.s32.totalorder %v287_v17, 2  ;;  %vm289_vm13 = vcmp.eq.s32.totalorder %v287_v17, 0 }
  0xe3   :  { %790 = vcosq.f32 %v281_v63  ;;  %v155_v4 = vsub.s32 0, %v153_v0  ;;  %v1205_v5 = vmul.f32 %v1078_v26, %v400_v44  ;;  %vm288_vm14 = vcmp.lt.s32.totalorder %v287_v17, 2 }
  0xe4   :  { %792 = vsinq.f32 %v281_v63  ;;  %v176_v51 = vsel %vm91_vm0, %v175_v52, %v1184_v27  ;;  %vm181_vm5 = vweird.f32 %v995_v53  ;;  %v526_v13 = vrot.slane %v522_v33, %v902_v21 }
  0xe5   :  { %v663_v7 = vmin.u32 %v155_v4, %v153_v0  ;;  %v538_v37 = vmul.f32 %v1083_v32, %v1205_v5  ;;  %v178_v56 = vsel %vm90_vm1, 0, %v176_v51  ;;  %v513_v47 = vmul.f32 %v900_v20, %v882_v9 }
  0xe6   :  { %v182_v35 = vadd.s32 3, %v178_v56  ;;  %v529_v10 = vmul.f32 %v526_v13, %v1205_v5 }
  0xe7   :  { %v157_v12 = vclz %v663_v7  ;;  %700 = vmatprep.subr.mxu0 %v538_v37  ;;  %729 = vmatprep.subr.mxu1 %v538_v37 }
  0xe8   :  { %701 = vmatpush3.msra.mxu0 %v538_v37  ;;  %741 = vmatpush3.msra.mxu1 %v538_v37  ;;  %v183_v23 = vand.u32 3, %v182_v35 }
  0xe9   :  { %v664_v14 = vadd.s32 4294967294, %v157_v12 }
  0xea   :  { %vm188_vm2 = vcmp.eq.s32.totalorder %v183_v23, 2  ;;  %vm185_vm3 = vcmp.eq.s32.totalorder %v183_v23, 0  ;;  %vm184_vm4 = vcmp.lt.s32.totalorder %v183_v23, 2 }
  0xeb   :  { %vm665_vm11 = vcmp.lt.s32.totalorder %v664_v14, 0 }
  0xec   :  { %v160_v58 = vsel %vm665_vm11, 0, %v664_v14 }
  0xed   :  { %v161_v22 = vsub.s32 32, %v160_v58  ;;  %v165_v24 = vsub.s32 4294967266, %v160_v58  ;;  %v162_v29 = vshll.u32 %v153_v0, %v160_v58  ;;  %v530_v0 = vmul.f32 %v526_v13, %v1180_v59 }
  0xef   :  { %v163_v28 = vshrl.u32 %v145_v18, %v161_v22  ;;  %v166_v62 = vadd.s32 127, %v165_v24 }
  0xf0   :  { %v791_v25 = vpop.eup %790 }
  0xf1   :  { %v793_v34 = vpop.eup %792  ;;  %v293_v38 = vxor.u32 2147483648, %v791_v25  ;;  %v164_v3 = vor.u32 %v163_v28, %v162_v29  ;;  %v167_v15 = vshll.u32 %v166_v62, 23 }
  0xf2   :  { %v290_v16 = vxor.u32 2147483648, %v793_v34 }
  0xf3   :  { %v294_v39 = vsel %vm292_vm12, %v293_v38, %v793_v34  ;;  %v168_v42 = vor.u32 4788187, %v167_v15  ;;  %v171_v31 = vcvt.s32.f32 %v164_v3 }
  0xf4   :  { %v291_v19 = vsel %vm289_vm13, %v791_v25, %v290_v16 }
  0xf5   :  { %v295_v8 = vsel %vm288_vm14, %v291_v19, %v294_v39  ;;  %v169_v30 = vand.u32 2147483647, %v168_v42 }
  0xf6   :  { %v296_v46 = vsel %vm285_vm15, nan, %v295_v8 }
  0xf7   :  { %v1215_v57 = vmul.f32 %v1078_v26, %v296_v46  ;;  %v172_v48 = vmul.f32 %v171_v31, %v169_v30 }
  0xf9   :  { %v537_v49 = vmul.f32 %v1083_v32, %v1215_v57  ;;  %v173_v50 = vxor.u32 2147483648, %v172_v48 }
  0xfb   :  { %702 = vmatprep.subr.mxu0 %v537_v49  ;;  %730 = vmatprep.subr.mxu1 %v537_v49  ;;  %v174_v45 = vsel %vm91_vm0, %v173_v50, %v172_v48 }
  0xfc   :  { %703 = vmatpush3.msra.mxu0 %v537_v49  ;;  %742 = vmatpush3.msra.mxu1 %v537_v49  ;;  %v177_v1 = vsel %vm90_vm1, %v995_v53, %v174_v45  ;;  %v528_v53 = vmul.f32 %v526_v13, %v1215_v57 }
  0xfd   :  { %794 = vcosq.f32 %v177_v1 }
  0xfe   :  { %796 = vsinq.f32 %v177_v1 }
 0x10a   :  { %v795_v61 = vpop.eup %794 }
 0x10b   :  { %v797_v2 = vpop.eup %796  ;;  %v189_v6 = vxor.u32 2147483648, %v795_v61 }
 0x10c   :  { %v186_v55 = vxor.u32 2147483648, %v797_v2 }
 0x10d   :  { %v190_v60 = vsel %vm188_vm2, %v189_v6, %v797_v2 }
 0x10e   :  { %v187_v54 = vsel %vm185_vm3, %v795_v61, %v186_v55 }
 0x10f   :  { %v191_v36 = vsel %vm184_vm4, %v187_v54, %v190_v60 }
 0x110   :  { %v192_v27 = vsel %vm181_vm5, nan, %v191_v36 }
 0x111   :  { %v509_v41 = vmul.f32 %v1078_v26, %v192_v27  ;;  %v517_v26 = vrot.slane %v513_v47, %v902_v21 }
 0x113   :  { %v536_v63 = vmul.f32 %v1083_v32, %v509_v41  ;;  %v527_v32 = vmul.f32 %v526_v13, %v509_v41  ;;  %v521_v9 = vmul.f32 %v517_v26, %v1180_v59  ;;  %v520_v20 = vmul.f32 %v517_v26, %v1205_v5  ;;  %v541_v59 = vld [vmem:[%s1254_s3 + $0x8] sm:$0xff]  ;;  %s798_s3 = scalar_lea.vmem %s652_s17, 512 }
 0x114   :  { %v519_v21 = vmul.f32 %v517_v26, %v1215_v57  ;;  %v518_v44 = vmul.f32 %v517_v26, %v509_v41  ;;  %p799_p0 = scmp.ne.s32.totalorder %s652_s17, %s798_s3  ;;  %p804_p2 = scmp.lt.s32.totalorder %s798_s3, %s798_s3 }
 0x115   :  { %704 = vmatprep.subr.mxu0 %v536_v63  ;;  %731 = vmatprep.subr.mxu1 %v536_v63 }
 0x116   :  { %705 = vmatpush3.msra.mxu0 %v536_v63  ;;  %743 = vmatpush3.msra.mxu1 %v536_v63  ;;  %p805_p3 = por %p804_p2, %p803_p1 }
 0x117   :  { %706 = vmatprep.subr.mxu0 %v530_v0  ;;  %732 = vmatprep.subr.mxu1 %v530_v0 }
 0x118   :  { %707 = vmatpush3.msra.mxu0 %v530_v0  ;;  %744 = vmatpush3.msra.mxu1 %v530_v0  ;;  %p806_p4 = pnand %p805_p3, %p799_p0 }
 0x119   :  { %708 = vmatprep.subr.mxu0 %v529_v10  ;;  %733 = vmatprep.subr.mxu1 %v529_v10 }
 0x11a   :  { %709 = vmatpush3.msra.mxu0 %v529_v10  ;;  %745 = vmatpush3.msra.mxu1 %v529_v10 }
 0x11b   :  { %710 = vmatprep.subr.mxu0 %v528_v53  ;;  %734 = vmatprep.subr.mxu1 %v528_v53 }
 0x11c   :  { %711 = vmatpush3.msra.mxu0 %v528_v53  ;;  %746 = vmatpush3.msra.mxu1 %v528_v53 }
 0x11d   :  { %712 = vmatprep.subr.mxu0 %v527_v32  ;;  %735 = vmatprep.subr.mxu1 %v527_v32 }
 0x11e   :  { %713 = vmatpush3.msra.mxu0 %v527_v32  ;;  %747 = vmatpush3.msra.mxu1 %v527_v32 }
 0x11f   :  { %714 = vmatprep.subr.mxu0 %v521_v9  ;;  %736 = vmatprep.subr.mxu1 %v521_v9 }
 0x120   :  { %715 = vmatpush3.msra.mxu0 %v521_v9  ;;  %748 = vmatpush3.msra.mxu1 %v521_v9 }
 0x121   :  { %716 = vmatprep.subr.mxu0 %v520_v20  ;;  %737 = vmatprep.subr.mxu1 %v520_v20 }
 0x122   :  { %717 = vmatpush3.msra.mxu0 %v520_v20  ;;  %749 = vmatpush3.msra.mxu1 %v520_v20 }
 0x123   :  { %718 = vmatprep.subr.mxu0 %v519_v21  ;;  %738 = vmatprep.subr.mxu1 %v519_v21 }
 0x124   :  { %719 = vmatpush3.msra.mxu0 %v519_v21  ;;  %750 = vmatpush3.msra.mxu1 %v519_v21 }
 0x125   :  { %720 = vmatprep.subr.mxu0 %v518_v44  ;;  %739 = vmatprep.subr.mxu1 %v518_v44 }
 0x126   :  { %721 = vmatpush3.msra.mxu0 %v518_v44  ;;  %751 = vmatpush3.msra.mxu1 %v518_v44 }
 0x127   :  { %723 = vmatmul.mubr.msk.f32.vlgmr.msra.gmra.mxu0 %vm544_vm9, %v541_v59  ;;  %726 = vmatmul.mubr.msk.f32.vlgmr.msra.gmra.mxu1 %vm544_vm9, %v543_v43 }
 0x1e7   :  { %v724_v4 = vpop.f32.mrf.mxu0  ;;  %v727_v5 = vpop.f32.mrf.mxu1 }
 0x1e8   :  { %643 = vst [vmem:[#allocation2 + $0x8] sm:$0xff] %v724_v4  ;;  %645 = vst [vmem:[#allocation2 + $0x18] sm:$0xff] %v727_v5 }
 0x1e9   :  { %v623_v7 = vpop.f32.mrf.mxu0  ;;  %v633_v37 = vpop.f32.mrf.mxu1 }
 0x1ea   :  { %642 = vst [vmem:[#allocation2] sm:$0xff] %v623_v7  ;;  %644 = vst [vmem:[#allocation2 + $0x10] sm:$0xff] %v633_v37 }
 0x1eb   :  { %809 = shalt.err (!%p806_p4)
}
 0x1ec   :  { %s828_s18 = smov 128   ;;  %s829_s19 = smov 8  }
 0x1ed   :  { %657 = dma.vmem_to_hbm [thread:$0]  %s652_s17, 512, %s1255_s4, [#allocation3], %s828_s18, %s828_s18, %s829_s19  }
 0x1ee   :  { %818 = dma.done.wait [#allocation3], 512  }
 0x1ef   :  { %819 = vsyncadd [#allocation3], 4294966784 }
 0x1f0   :  { %661 = vsyncpa [#allocation3], 1 }

</bundles_post_ra>
